<compile_context>
chip_gen: v7x
topology: tpu7x:2x2x1
jax: 0.10.0
libtpu: 0.0.40
codegen_flags: <defaults>
</compile_context>

<pallas_src>
import functools

import jax
import jax.numpy as jnp
from jax.experimental import pallas as pl
from jax.experimental.pallas import tpu as pltpu


def _round_up(x: int, m: int) -> int:
    return ((x + m - 1) // m) * m


def _value_critic_kernel(x_ref, w1_ref, b1_ref, w2_ref, b2_ref, w3_ref, out_ref):
    """One batch tile: relu(x@w1+b1) -> relu(.@w2+b2) -> .@w3 (all MXU, f32 acc)."""
    cd = w1_ref.dtype                          # MXU input dtype (bf16 or f32)

    # In-kernel activation pack to the MXU dtype (hidden under MXU/DMA slack).
    x = x_ref[...].astype(cd)

    # Layer 1: MXU matmul with f32 accumulation, bias + ReLU on the VPU in f32.
    h1 = jnp.dot(x, w1_ref[...], preferred_element_type=jnp.float32)
    h1 = jnp.maximum(h1 + b1_ref[...], 0.0)

    # Layer 2: K=256 exactly fills a v6e/v7x 256-wide MXU pass.
    h2 = jnp.dot(h1.astype(cd), w2_ref[...], preferred_element_type=jnp.float32)
    h2 = jnp.maximum(h2 + b2_ref[...], 0.0)

    # Layer 3: N=1 MXU matmul (keeps the vector-extended slots free of XLU reduces).
    q = jnp.dot(h2.astype(cd), w3_ref[...], preferred_element_type=jnp.float32)
    out_ref[...] = q.astype(out_ref.dtype)     # (bm, 1) f32


@functools.partial(jax.jit, static_argnames=("block_m", "compute_dtype"))
def value_critic_forward(state, params, *, block_m=2048, compute_dtype=jnp.bfloat16):
    """Fused ValueCritic forward pass. state: [B, state_dim] -> [B, 1] (f32)."""
    w1, b1, w2, b2, w3, b3 = params
    B, state_dim = state.shape
    H = w1.shape[1]                                            # 256

    # Batch tile: big (amortizes the ~0.35us/grid-step overhead), 128-multiple,
    # but (a) >= 2 grid steps when B > 128 so v7x megacore uses both TensorCores,
    # and (b) never larger than the (8-rounded) batch so blocks never exceed the array.
    bm = min(_round_up(block_m, 128), _round_up(B, 128))
    if B > 128:
        bm = min(bm, _round_up((B + 1) // 2, 128))
    bm = max(8, min(bm, _round_up(B, 8)))
    grid = (pl.cdiv(B, bm),)                                   # partial last block OK

    cd = compute_dtype
    w1c = w1.astype(cd)                                        # (state_dim, 256), tiny
    w2c = w2.astype(cd)                                        # (256, 256)
    w3c = w3.reshape(H, 1).astype(cd)                          # (256, 1)
    b1c = b1.reshape(1, H).astype(jnp.float32)
    b2c = b2.reshape(1, H).astype(jnp.float32)

    in_specs = [
        # state tile: last dim == full array dim, so no (.,128) divisibility needed
        pl.BlockSpec((bm, state_dim), lambda i: (i, 0)),
        pl.BlockSpec((state_dim, H), lambda i: (0, 0)),        # w1 (VMEM-resident)
        pl.BlockSpec((1, H), lambda i: (0, 0)),                # b1
        pl.BlockSpec((H, H), lambda i: (0, 0)),                # w2
        pl.BlockSpec((1, H), lambda i: (0, 0)),                # b2
        pl.BlockSpec((H, 1), lambda i: (0, 0)),                # w3 column
    ]
    out_specs = pl.BlockSpec((bm, 1), lambda i: (i, 0))

    out = pl.pallas_call(
        _value_critic_kernel,
        out_shape=jax.ShapeDtypeStruct((B, 1), jnp.float32),
        grid_spec=pltpu.PrefetchScalarGridSpec(
            num_scalar_prefetch=0,
            grid=grid,
            in_specs=in_specs,
            out_specs=out_specs,
        ),
        compiler_params=pltpu.CompilerParams(
            dimension_semantics=("parallel",)),                # megacore-shardable
    )(state, w1c, b1c, w2c, b2c, w3c)

    # b3 is a single scalar: add it here instead of DMAing a padded VMEM tile per step.
    return out + b3.reshape(1, 1).astype(jnp.float32)


def init_value_critic_params(key, state_dim, hidden=256):
    """Mirror PyTorch nn.Linear default init: U(-1/sqrt(fan_in), 1/sqrt(fan_in))."""
    ks = jax.random.split(key, 6)

    def linear_init(kw, kb, fan_in, fan_out):
        bound = 1.0 / jnp.sqrt(jnp.float32(fan_in))
        w = jax.random.uniform(kw, (fan_in, fan_out), jnp.float32, -bound, bound)
        b = jax.random.uniform(kb, (1, fan_out), jnp.float32, -bound, bound)
        return w, b

    w1, b1 = linear_init(ks[0], ks[1], state_dim, hidden)
    w2, b2 = linear_init(ks[2], ks[3], hidden, hidden)
    w3, b3 = linear_init(ks[4], ks[5], hidden, 1)
    return (w1, b1, w2, b2, w3, b3)


def value_critic_reference(state, params):
    """Pure-JAX reference for correctness checks."""
    w1, b1, w2, b2, w3, b3 = params
    h1 = jnp.maximum(state @ w1 + b1, 0.0)
    h2 = jnp.maximum(h1 @ w2 + b2, 0.0)
    return h2 @ w3 + b3


if __name__ == "__main__":
    key = jax.random.PRNGKey(0)
    k_params, k_state, k_state2 = jax.random.split(key, 3)

    state_dim = 16
    params = init_value_critic_params(k_params, state_dim)

    # Small smoke test (B=8): single (partial) tile, no padding anywhere.
    state = jax.random.normal(k_state, (8, state_dim), dtype=jnp.float32)
    q_ref = value_critic_reference(state, params)

    q_f32 = jax.block_until_ready(
        value_critic_forward(state, params, compute_dtype=jnp.float32))
    assert q_f32.shape == (8, 1)
    assert jnp.allclose(q_f32, q_ref, atol=1e-3, rtol=1e-3), "f32 mismatch vs reference"

    q_bf16 = jax.block_until_ready(value_critic_forward(state, params))  # bf16 default
    assert q_bf16.shape == (8, 1)
    assert jnp.allclose(q_bf16, q_ref, atol=5e-2, rtol=5e-2), "bf16 mismatch vs reference"

    # Multi-tile grid with a batch that is NOT a tile multiple (partial last block,
    # >=2 grid steps for megacore sharding).
    state2 = jax.random.normal(k_state2, (300, state_dim), dtype=jnp.float32)
    q2_ref = value_critic_reference(state2, params)

    q2_f32 = jax.block_until_ready(
        value_critic_forward(state2, params, compute_dtype=jnp.float32))
    assert q2_f32.shape == (300, 1)
    assert jnp.allclose(q2_f32, q2_ref, atol=1e-3, rtol=1e-3), "multi-tile f32 mismatch"

    q2_bf16 = jax.block_until_ready(value_critic_forward(state2, params))
    assert q2_bf16.shape == (300, 1)
    assert jnp.allclose(q2_bf16, q2_ref, atol=5e-2, rtol=5e-2), "multi-tile bf16 mismatch"

    print("KERNEL_OK")
</pallas_src>

<mosaic_0001>
module attributes {stable_mosaic.version = 11 : i64} {
  func.func @_value_critic_kernel(%arg0: i32, %arg1: memref<8x16xf32, #tpu.memory_space<vmem>>, %arg2: memref<16x256xf32, #tpu.memory_space<vmem>>, %arg3: memref<1x256xf32, #tpu.memory_space<vmem>>, %arg4: memref<256x256xf32, #tpu.memory_space<vmem>>, %arg5: memref<1x256xf32, #tpu.memory_space<vmem>>, %arg6: memref<256x1xf32, #tpu.memory_space<vmem>>, %arg7: memref<8x1xf32, #tpu.memory_space<vmem>>) attributes {dimension_semantics = [#tpu.dimension_semantics<parallel>], iteration_bounds = array<i64: 1>, scalar_prefetch = 0 : i64, scratch_operands = 0 : i64, tpu.core_type = #tpu.core_type<tc>, window_params = [{transform_indices = @transform_0, window_bounds = array<i64: 8, 16>}, {pipeline_mode = #tpu.pipeline_mode<synchronous>, transform_indices = @transform_1, window_bounds = array<i64: 16, 256>}, {pipeline_mode = #tpu.pipeline_mode<synchronous>, transform_indices = @transform_2, window_bounds = array<i64: 1, 256>}, {pipeline_mode = #tpu.pipeline_mode<synchronous>, transform_indices = @transform_3, window_bounds = array<i64: 256, 256>}, {pipeline_mode = #tpu.pipeline_mode<synchronous>, transform_indices = @transform_4, window_bounds = array<i64: 1, 256>}, {pipeline_mode = #tpu.pipeline_mode<synchronous>, transform_indices = @transform_5, window_bounds = array<i64: 256, 1>}, {transform_indices = @transform_6, window_bounds = array<i64: 8, 1>}]} {
    %c0 = arith.constant 0 : index
    %c0_0 = arith.constant 0 : index
    %0 = vector.load %arg1[%c0, %c0_0] : memref<8x16xf32, #tpu.memory_space<vmem>>, vector<8x16xf32>
    %c0_1 = arith.constant 0 : index
    %c0_2 = arith.constant 0 : index
    %1 = vector.load %arg2[%c0_1, %c0_2] : memref<16x256xf32, #tpu.memory_space<vmem>>, vector<16x256xf32>
    %cst = arith.constant dense<0.000000e+00> : vector<8x256xf32>
    %2 = tpu.matmul %0, %1, %cst {dimension_numbers = #tpu.dot_dimension_numbers<[1], [0], [0], [1], [0, 0, 1, 1], [], []>} : vector<8x16xf32>, vector<16x256xf32>, vector<8x256xf32> -> vector<8x256xf32>
    %c0_3 = arith.constant 0 : index
    %c0_4 = arith.constant 0 : index
    %3 = vector.load %arg3[%c0_3, %c0_4] : memref<1x256xf32, #tpu.memory_space<vmem>>, vector<1x256xf32>
    %4 = vector.broadcast %3 : vector<1x256xf32> to vector<8x256xf32>
    %5 = arith.addf %2, %4 : vector<8x256xf32>
    %cst_5 = arith.constant 0.000000e+00 : f32
    %6 = vector.broadcast %cst_5 : f32 to vector<8x256xf32>
    %7 = arith.maximumf %5, %6 : vector<8x256xf32>
    %c0_6 = arith.constant 0 : index
    %c0_7 = arith.constant 0 : index
    %8 = vector.load %arg4[%c0_6, %c0_7] : memref<256x256xf32, #tpu.memory_space<vmem>>, vector<256x256xf32>
    %cst_8 = arith.constant dense<0.000000e+00> : vector<8x256xf32>
    %9 = tpu.matmul %7, %8, %cst_8 {dimension_numbers = #tpu.dot_dimension_numbers<[1], [0], [0], [1], [0, 0, 1, 1], [], []>} : vector<8x256xf32>, vector<256x256xf32>, vector<8x256xf32> -> vector<8x256xf32>
    %c0_9 = arith.constant 0 : index
    %c0_10 = arith.constant 0 : index
    %10 = vector.load %arg5[%c0_9, %c0_10] : memref<1x256xf32, #tpu.memory_space<vmem>>, vector<1x256xf32>
    %11 = vector.broadcast %10 : vector<1x256xf32> to vector<8x256xf32>
    %12 = arith.addf %9, %11 : vector<8x256xf32>
    %cst_11 = arith.constant 0.000000e+00 : f32
    %13 = vector.broadcast %cst_11 : f32 to vector<8x256xf32>
    %14 = arith.maximumf %12, %13 : vector<8x256xf32>
    %c0_12 = arith.constant 0 : index
    %c0_13 = arith.constant 0 : index
    %15 = vector.load %arg6[%c0_12, %c0_13] : memref<256x1xf32, #tpu.memory_space<vmem>>, vector<256x1xf32>
    %cst_14 = arith.constant dense<0.000000e+00> : vector<8x1xf32>
    %16 = tpu.matmul %14, %15, %cst_14 {dimension_numbers = #tpu.dot_dimension_numbers<[1], [0], [0], [1], [0, 0, 1, 1], [], []>} : vector<8x256xf32>, vector<256x1xf32>, vector<8x1xf32> -> vector<8x1xf32>
    %c0_15 = arith.constant 0 : index
    %c0_16 = arith.constant 0 : index
    %17 = vector.load %arg7[%c0_15, %c0_16] : memref<8x1xf32, #tpu.memory_space<vmem>>, vector<8x1xf32>
    tpu.vector_store %arg7[%c0_15, %c0_16], %16 {strides = array<i32>} : memref<8x1xf32, #tpu.memory_space<vmem>>, vector<8x1xf32>,
    return
  }
  func.func @transform_0(%arg0: i32) -> (i32, i32) {
    %c0_i32 = arith.constant 0 : i32
    %c0_i32_0 = arith.constant 0 : i32
    return %arg0, %c0_i32 : i32, i32
  }
  func.func @transform_1(%arg0: i32) -> (i32, i32) {
    %c0_i32 = arith.constant 0 : i32
    %c0_i32_0 = arith.constant 0 : i32
    %c0_i32_1 = arith.constant 0 : i32
    return %c0_i32, %c0_i32_0 : i32, i32
  }
  func.func @transform_2(%arg0: i32) -> (i32, i32) {
    %c0_i32 = arith.constant 0 : i32
    %c0_i32_0 = arith.constant 0 : i32
    %c0_i32_1 = arith.constant 0 : i32
    return %c0_i32, %c0_i32_0 : i32, i32
  }
  func.func @transform_3(%arg0: i32) -> (i32, i32) {
    %c0_i32 = arith.constant 0 : i32
    %c0_i32_0 = arith.constant 0 : i32
    %c0_i32_1 = arith.constant 0 : i32
    return %c0_i32, %c0_i32_0 : i32, i32
  }
  func.func @transform_4(%arg0: i32) -> (i32, i32) {
    %c0_i32 = arith.constant 0 : i32
    %c0_i32_0 = arith.constant 0 : i32
    %c0_i32_1 = arith.constant 0 : i32
    return %c0_i32, %c0_i32_0 : i32, i32
  }
  func.func @transform_5(%arg0: i32) -> (i32, i32) {
    %c0_i32 = arith.constant 0 : i32
    %c0_i32_0 = arith.constant 0 : i32
    %c0_i32_1 = arith.constant 0 : i32
    return %c0_i32, %c0_i32_0 : i32, i32
  }
  func.func @transform_6(%arg0: i32) -> (i32, i32) {
    %c0_i32 = arith.constant 0 : i32
    %c0_i32_0 = arith.constant 0 : i32
    return %arg0, %c0_i32 : i32, i32
  }
}

</mosaic_0001>

<bundles_post_ra>
// kernel: value_critic_forward.1
= control target key start
LH: loop header
LB: loop body
LE: loop exit
PB: predicated region body
PF: predicated region fallthrough
CT: control target
= control target key end

     0   :  { %11 = vsyncpa [#allocation3], 0  ;;  %s553_s21 = smov [#allocation2]   ;;  %s724_s0 = inlined_call_operand.vmem [shape: f32[8,16], index: 0, kind: input, shape index: {}]   ;;  %s725_s1 = inlined_call_operand.vmem [shape: f32[16,256], index: 1, kind: input, shape index: {}]   ;;  %s726_s2 = inlined_call_operand.vmem [shape: f32[1,256], index: 2, kind: input, shape index: {}]   ;;  %s727_s3 = inlined_call_operand.hbm [shape: f32[256,256], index: 3, kind: input, shape index: {}]   ;;  %s728_s4 = inlined_call_operand.vmem [shape: f32[1,256], index: 4, kind: input, shape index: {}]   ;;  %s729_s5 = inlined_call_operand.vmem [shape: f32[256,1], index: 5, kind: input, shape index: {}]   ;;  %s730_s6 = inlined_call_operand.vmem [shape: f32[8,1], index: 6, kind: output, shape index: {}]  }
   0x1   :  { %s23_s22 = sshll.u32 %s553_s21, 4  ;;  %s529_s25 = scalar_lea.hbm %s727_s3, 8192  ;;  %s24_s22 = int_to_ptr.vmem [resolvable:$true] %s23_s22 }
   0x2   :  { %p530_p0 = scmp.ne.s32.totalorder %s727_s3, %s529_s25  ;;  %p533_p1 = scmp.lt.u32.totalorder %s529_s25, %s727_s3 }
   0x4   :  { %p535_p2 = pnand %p533_p1, %p530_p0 }
   0x6   :  { %538 = shalt.err (!%p535_p2)
}
   0x7   :  { %s539_s30 = scalar_lea.vmem %s24_s22, 8192  ;;  %p544_p4 = scmp.lt.s32.totalorder %s24_s22, %s24_s22 }
   0x8   :  { %p540_p3 = scmp.ne.s32.totalorder %s24_s22, %s539_s30  ;;  %p545_p5 = scmp.lt.s32.totalorder %s539_s30, %s539_s30 }
   0xa   :  { %p546_p6 = por %p545_p5, %p544_p4 }
   0xc   :  { %p547_p7 = pnand %p546_p6, %p540_p3 }
   0xe   :  { %550 = shalt.err (!%p547_p7)
}
   0xf   :  { %s554_s7 = smov 256   ;;  %s555_s8 = smov 16  }
  0x10   :  { %29 = dma.hbm_to_vmem [thread:$0]  %s727_s3, 8192, %s24_s22, [#allocation3], %s554_s7, %s554_s7, %s555_s8  }
  0x11   :  { %551 = dma.done.wait [#allocation3], 8192  }
  0x12   :  { %552 = vsyncadd [#allocation3], 4294959104  ;;  %v556_v0 = vmov 0.0   ;;  %v39_v1 = vld [vmem:[%s725_s1 + $0x8] sm:$0xff]  ;;  %v41_v2 = vld [vmem:[%s725_s1 + $0x18] sm:$0xff]  ;;  %vm54_vm0 = vcmask 130048  }
  0x13   :  { %122 = vmatprep.mubr.f32.mxu0 %v556_v0  ;;  %v38_v3 = vld [vmem:[%s725_s1] sm:$0xff]  ;;  %v425_v4 = vpack.c.bf16 %v41_v2, %v39_v1  ;;  %v40_v5 = vld [vmem:[%s725_s1 + $0x10] sm:$0xff]  ;;  %v132_v6 = vld [vmem:[#allocation2 + $0x8] sm:$0xff]  ;;  %vm382_vm1 = vcmask 7168  }
  0x14   :  { %v427_v7 = vpack.c.bf16 %v40_v5, %v38_v3  ;;  %v37_v8 = vld [vmem:[%s724_s0] sm:$0xff]  ;;  %v134_v9 = vld [vmem:[#allocation2 + $0x18] sm:$0xff]  ;;  %v133_v11 = vld [vmem:[#allocation2 + $0x10] sm:$0xff] }
  0x15   :  { %v131_v10 = vld [vmem:[#allocation2] sm:$0xff]  ;;  %426 = vmatprep.subr.bf16.mxu0 %v425_v4  ;;  %v429_v12 = vpack.c.bf16 %v134_v9, %v132_v6  ;;  %v136_v14 = vld [vmem:[#allocation2 + $0x28] sm:$0xff]  ;;  %v138_v15 = vld [vmem:[#allocation2 + $0x38] sm:$0xff] }
  0x16   :  { %v431_v13 = vpack.c.bf16 %v133_v11, %v131_v10  ;;  %v135_v16 = vld [vmem:[#allocation2 + $0x20] sm:$0xff]  ;;  %428 = vmatpush1.bf16.msra.mxu0 %v427_v7  ;;  %v433_v17 = vpack.c.bf16 %v138_v15, %v136_v14  ;;  %v137_v18 = vld [vmem:[#allocation2 + $0x30] sm:$0xff]  ;;  %v140_v19 = vld [vmem:[#allocation2 + $0x48] sm:$0xff] }
  0x17   :  { %v142_v20 = vld [vmem:[#allocation2 + $0x58] sm:$0xff]  ;;  %430 = vmatprep.subr.bf16.mxu1 %v429_v12  ;;  %v435_v21 = vpack.c.bf16 %v137_v18, %v135_v16  ;;  %v139_v23 = vld [vmem:[#allocation2 + $0x40] sm:$0xff]  ;;  %v141_v24 = vld [vmem:[#allocation2 + $0x50] sm:$0xff] }
  0x18   :  { %432 = vmatpush1.bf16.msra.mxu1 %v431_v13  ;;  %v437_v22 = vpack.c.bf16 %v142_v20, %v140_v19  ;;  %v144_v25 = vld [vmem:[#allocation2 + $0x68] sm:$0xff]  ;;  %v146_v26 = vld [vmem:[#allocation2 + $0x78] sm:$0xff]  ;;  %v439_v27 = vpack.c.bf16 %v141_v24, %v139_v23  ;;  %v143_v29 = vld [vmem:[#allocation2 + $0x60] sm:$0xff] }
  0x19   :  { %389 = vmatmul.mubr.msk.f32.vlgmr.msra.gmra.mrb[0].mxu0 %vm54_vm0, %v37_v8  ;;  %434 = vmatprep.subr.bf16.mxu1 %v433_v17  ;;  %v441_v28 = vpack.c.bf16 %v146_v26, %v144_v25  ;;  %v145_v30 = vld [vmem:[#allocation2 + $0x70] sm:$0xff]  ;;  %v148_v31 = vld [vmem:[#allocation2 + $0x88] sm:$0xff]  ;;  %v150_v32 = vld [vmem:[#allocation2 + $0x98] sm:$0xff] }
  0x1a   :  { %v443_v33 = vpack.c.bf16 %v145_v30, %v143_v29  ;;  %v445_v34 = vpack.c.bf16 %v150_v32, %v148_v31  ;;  %v147_v35 = vld [vmem:[#allocation2 + $0x80] sm:$0xff]  ;;  %v149_v36 = vld [vmem:[#allocation2 + $0x90] sm:$0xff]  ;;  %v152_v37 = vld [vmem:[#allocation2 + $0xa8] sm:$0xff] }
  0x1b   :  { %v154_v38 = vld [vmem:[#allocation2 + $0xb8] sm:$0xff]  ;;  %v447_v39 = vpack.c.bf16 %v149_v36, %v147_v35  ;;  %v151_v41 = vld [vmem:[#allocation2 + $0xa0] sm:$0xff]  ;;  %v153_v42 = vld [vmem:[#allocation2 + $0xb0] sm:$0xff] }
  0x1c   :  { %436 = vmatpush1.bf16.msra.mxu1 %v435_v21  ;;  %v449_v40 = vpack.c.bf16 %v154_v38, %v152_v37  ;;  %v156_v43 = vld [vmem:[#allocation2 + $0xc8] sm:$0xff]  ;;  %v158_v44 = vld [vmem:[#allocation2 + $0xd8] sm:$0xff]  ;;  %v451_v45 = vpack.c.bf16 %v153_v42, %v151_v41  ;;  %v155_v47 = vld [vmem:[#allocation2 + $0xc0] sm:$0xff] }
  0x1d   :  { %438 = vmatprep.subr.bf16.mxu1 %v437_v22  ;;  %v453_v46 = vpack.c.bf16 %v158_v44, %v156_v43  ;;  %v157_v48 = vld [vmem:[#allocation2 + $0xd0] sm:$0xff]  ;;  %v160_v49 = vld [vmem:[#allocation2 + $0xe8] sm:$0xff]  ;;  %v162_v50 = vld [vmem:[#allocation2 + $0xf8] sm:$0xff] }
  0x1e   :  { %v455_v51 = vpack.c.bf16 %v157_v48, %v155_v47  ;;  %v457_v52 = vpack.c.bf16 %v162_v50, %v160_v49  ;;  %v159_v53 = vld [vmem:[#allocation2 + $0xe0] sm:$0xff]  ;;  %v161_v54 = vld [vmem:[#allocation2 + $0xf0] sm:$0xff]  ;;  %v164_v55 = vld [vmem:[#allocation2 + $0x108] sm:$0xff] }
  0x1f   :  { %v166_v56 = vld [vmem:[#allocation2 + $0x118] sm:$0xff]  ;;  %v459_v57 = vpack.c.bf16 %v161_v54, %v159_v53  ;;  %v163_v59 = vld [vmem:[#allocation2 + $0x100] sm:$0xff]  ;;  %v165_v60 = vld [vmem:[#allocation2 + $0x110] sm:$0xff] }
  0x20   :  { %440 = vmatpush1.bf16.msra.mxu1 %v439_v27  ;;  %v461_v58 = vpack.c.bf16 %v166_v56, %v164_v55  ;;  %v168_v61 = vld [vmem:[#allocation2 + $0x128] sm:$0xff]  ;;  %v170_v62 = vld [vmem:[#allocation2 + $0x138] sm:$0xff]  ;;  %v463_v63 = vpack.c.bf16 %v165_v60, %v163_v59  ;;  %v167_v1 = vld [vmem:[#allocation2 + $0x120] sm:$0xff] }
  0x21   :  { %442 = vmatprep.subr.bf16.mxu1 %v441_v28  ;;  %v465_v0 = vpack.c.bf16 %v170_v62, %v168_v61  ;;  %v169_v2 = vld [vmem:[#allocation2 + $0x130] sm:$0xff]  ;;  %v172_v3 = vld [vmem:[#allocation2 + $0x148] sm:$0xff]  ;;  %v174_v4 = vld [vmem:[#allocation2 + $0x158] sm:$0xff] }
  0x22   :  { %v467_v5 = vpack.c.bf16 %v169_v2, %v167_v1  ;;  %v469_v6 = vpack.c.bf16 %v174_v4, %v172_v3  ;;  %v171_v7 = vld [vmem:[#allocation2 + $0x140] sm:$0xff]  ;;  %v173_v8 = vld [vmem:[#allocation2 + $0x150] sm:$0xff]  ;;  %v176_v9 = vld [vmem:[#allocation2 + $0x168] sm:$0xff] }
  0x23   :  { %v178_v10 = vld [vmem:[#allocation2 + $0x178] sm:$0xff]  ;;  %v471_v11 = vpack.c.bf16 %v173_v8, %v171_v7  ;;  %v175_v13 = vld [vmem:[#allocation2 + $0x160] sm:$0xff]  ;;  %v177_v14 = vld [vmem:[#allocation2 + $0x170] sm:$0xff] }
  0x24   :  { %444 = vmatpush1.bf16.msra.mxu1 %v443_v33  ;;  %v473_v12 = vpack.c.bf16 %v178_v10, %v176_v9  ;;  %v180_v15 = vld [vmem:[#allocation2 + $0x188] sm:$0xff]  ;;  %v182_v16 = vld [vmem:[#allocation2 + $0x198] sm:$0xff]  ;;  %v475_v17 = vpack.c.bf16 %v177_v14, %v175_v13  ;;  %v179_v19 = vld [vmem:[#allocation2 + $0x180] sm:$0xff] }
  0x25   :  { %446 = vmatprep.subr.bf16.mxu1 %v445_v34  ;;  %v477_v18 = vpack.c.bf16 %v182_v16, %v180_v15  ;;  %v181_v20 = vld [vmem:[#allocation2 + $0x190] sm:$0xff]  ;;  %v184_v21 = vld [vmem:[#allocation2 + $0x1a8] sm:$0xff]  ;;  %v186_v22 = vld [vmem:[#allocation2 + $0x1b8] sm:$0xff]  ;;  %v44_v15 = vlaneseq }
  0x26   :  { %v479_v23 = vpack.c.bf16 %v181_v20, %v179_v19  ;;  %v481_v24 = vpack.c.bf16 %v186_v22, %v184_v21  ;;  %v183_v25 = vld [vmem:[#allocation2 + $0x1a0] sm:$0xff]  ;;  %v185_v26 = vld [vmem:[#allocation2 + $0x1b0] sm:$0xff]  ;;  %v188_v27 = vld [vmem:[#allocation2 + $0x1c8] sm:$0xff] }
  0x27   :  { %v190_v28 = vld [vmem:[#allocation2 + $0x1d8] sm:$0xff]  ;;  %v483_v29 = vpack.c.bf16 %v185_v26, %v183_v25  ;;  %v187_v31 = vld [vmem:[#allocation2 + $0x1c0] sm:$0xff]  ;;  %v189_v32 = vld [vmem:[#allocation2 + $0x1d0] sm:$0xff]  ;;  %v45_v16 = vshrl.u32 %v44_v15, 7 }
  0x28   :  { %448 = vmatpush1.bf16.msra.mxu1 %v447_v39  ;;  %v485_v30 = vpack.c.bf16 %v190_v28, %v188_v27  ;;  %v487_v33 = vpack.c.bf16 %v189_v32, %v187_v31  ;;  %v192_v34 = vld [vmem:[#allocation2 + $0x1e8] sm:$0xff]  ;;  %v194_v35 = vld [vmem:[#allocation2 + $0x1f8] sm:$0xff]  ;;  %v191_v37 = vld [vmem:[#allocation2 + $0x1e0] sm:$0xff] }
  0x29   :  { %450 = vmatprep.subr.bf16.mxu1 %v449_v40  ;;  %v489_v36 = vpack.c.bf16 %v194_v35, %v192_v34  ;;  %v193_v38 = vld [vmem:[#allocation2 + $0x1f0] sm:$0xff]  ;;  %v296_v40 = vld [vmem:[%s729_s5 + $0x80] sm:$0xff]  ;;  %v297_v41 = vld [vmem:[%s729_s5 + $0x88] sm:$0xff]  ;;  %v50_v19 = vsub.s32 1, %v45_v16 }
  0x2a   :  { %v491_v39 = vpack.c.bf16 %v193_v38, %v191_v37  ;;  %v280_v42 = vld [vmem:[%s729_s5] sm:$0xff]  ;;  %v493_v43 = vpack.c.bf16 %v297_v41, %v296_v40  ;;  %v281_v44 = vld [vmem:[%s729_s5 + $0x8] sm:$0xff]  ;;  %v282_v49 = vld [vmem:[%s729_s5 + $0x10] sm:$0xff] }
  0x2b   :  { %v495_v47 = vpack.c.bf16 %v281_v44, %v280_v42  ;;  %v283_v50 = vld [vmem:[%s729_s5 + $0x18] sm:$0xff]  ;;  %v284_v55 = vld [vmem:[%s729_s5 + $0x20] sm:$0xff]  ;;  %v285_v56 = vld [vmem:[%s729_s5 + $0x28] sm:$0xff] }
  0x2c   :  { %452 = vmatpush1.bf16.msra.mxu1 %v451_v45  ;;  %v298_v45 = vld [vmem:[%s729_s5 + $0x90] sm:$0xff]  ;;  %494 = vmatprep.subr.bf16.mxu0 %v493_v43  ;;  %v499_v53 = vpack.c.bf16 %v283_v50, %v282_v49  ;;  %v503_v59 = vpack.c.bf16 %v285_v56, %v284_v55  ;;  %v287_v62 = vld [vmem:[%s729_s5 + $0x38] sm:$0xff]  ;;  %v288_v3 = vld [vmem:[%s729_s5 + $0x40] sm:$0xff] }
  0x2d   :  { %454 = vmatprep.subr.bf16.mxu1 %v453_v46  ;;  %v299_v46 = vld [vmem:[%s729_s5 + $0x98] sm:$0xff]  ;;  %496 = vmatpush3.bf16.msra.mxu0 %v495_v47  ;;  %v286_v61 = vld [vmem:[%s729_s5 + $0x30] sm:$0xff]  ;;  %v289_v4 = vld [vmem:[%s729_s5 + $0x48] sm:$0xff] }
  0x2e   :  { %v497_v48 = vpack.c.bf16 %v299_v46, %v298_v45  ;;  %v507_v1 = vpack.c.bf16 %v287_v62, %v286_v61  ;;  %v511_v7 = vpack.c.bf16 %v289_v4, %v288_v3  ;;  %v290_v9 = vld [vmem:[%s729_s5 + $0x50] sm:$0xff]  ;;  %v291_v10 = vld [vmem:[%s729_s5 + $0x58] sm:$0xff]  ;;  %v292_v28 = vld [vmem:[%s729_s5 + $0x60] sm:$0xff] }
  0x2f   :  { %v515_v13 = vpack.c.bf16 %v291_v10, %v290_v9  ;;  %v310_v31 = vld [vmem:[%s729_s5 + $0xf0] sm:$0xff]  ;;  %v311_v32 = vld [vmem:[%s729_s5 + $0xf8] sm:$0xff]  ;;  %v195_v37 = vld [vmem:[%s728_s4] sm:$0x3] }
  0x30   :  { %456 = vmatpush1.bf16.msra.mxu1 %v455_v51  ;;  %v300_v51 = vld [vmem:[%s729_s5 + $0xa0] sm:$0xff]  ;;  %498 = vmatprep.subr.bf16.mxu0 %v497_v48  ;;  %v294_v34 = vld [vmem:[%s729_s5 + $0x70] sm:$0xff]  ;;  %v295_v35 = vld [vmem:[%s729_s5 + $0x78] sm:$0xff] }
  0x31   :  { %458 = vmatprep.subr.bf16.mxu1 %v457_v52  ;;  %v301_v52 = vld [vmem:[%s729_s5 + $0xa8] sm:$0xff]  ;;  %500 = vmatpush3.bf16.msra.mxu0 %v499_v53 }
  0x32   :  { %v501_v54 = vpack.c.bf16 %v301_v52, %v300_v51 }
  0x34   :  { %460 = vmatpush1.bf16.msra.mxu1 %v459_v57  ;;  %v302_v57 = vld [vmem:[%s729_s5 + $0xb0] sm:$0xff]  ;;  %502 = vmatprep.subr.bf16.mxu0 %v501_v54 }
  0x35   :  { %462 = vmatprep.subr.bf16.mxu1 %v461_v58  ;;  %v303_v58 = vld [vmem:[%s729_s5 + $0xb8] sm:$0xff]  ;;  %504 = vmatpush3.bf16.msra.mxu0 %v503_v59 }
  0x36   :  { %v505_v60 = vpack.c.bf16 %v303_v58, %v302_v57 }
  0x38   :  { %464 = vmatpush1.bf16.msra.mxu1 %v463_v63  ;;  %v304_v63 = vld [vmem:[%s729_s5 + $0xc0] sm:$0xff]  ;;  %506 = vmatprep.subr.bf16.mxu0 %v505_v60 }
  0x39   :  { %466 = vmatprep.subr.bf16.mxu1 %v465_v0  ;;  %v305_v0 = vld [vmem:[%s729_s5 + $0xc8] sm:$0xff]  ;;  %508 = vmatpush3.bf16.msra.mxu0 %v507_v1 }
  0x3a   :  { %v509_v2 = vpack.c.bf16 %v305_v0, %v304_v63 }
  0x3c   :  { %468 = vmatpush1.bf16.msra.mxu1 %v467_v5  ;;  %v306_v5 = vld [vmem:[%s729_s5 + $0xd0] sm:$0xff]  ;;  %510 = vmatprep.subr.bf16.mxu0 %v509_v2 }
  0x3d   :  { %470 = vmatprep.subr.bf16.mxu1 %v469_v6  ;;  %v307_v6 = vld [vmem:[%s729_s5 + $0xd8] sm:$0xff]  ;;  %512 = vmatpush3.bf16.msra.mxu0 %v511_v7 }
  0x3e   :  { %v513_v8 = vpack.c.bf16 %v307_v6, %v306_v5 }
  0x40   :  { %472 = vmatpush1.bf16.msra.mxu1 %v471_v11  ;;  %v308_v11 = vld [vmem:[%s729_s5 + $0xe0] sm:$0xff]  ;;  %514 = vmatprep.subr.bf16.mxu0 %v513_v8 }
  0x41   :  { %474 = vmatprep.subr.bf16.mxu1 %v473_v12  ;;  %v309_v12 = vld [vmem:[%s729_s5 + $0xe8] sm:$0xff]  ;;  %516 = vmatpush3.bf16.msra.mxu0 %v515_v13 }
  0x42   :  { %v517_v14 = vpack.c.bf16 %v309_v12, %v308_v11 }
  0x44   :  { %476 = vmatpush1.bf16.msra.mxu1 %v475_v17  ;;  %518 = vmatprep.subr.bf16.mxu0 %v517_v14  ;;  %v46_v17 = vsub.s32 0, %v45_v16 }
  0x45   :  { %478 = vmatprep.subr.bf16.mxu1 %v477_v18  ;;  %v42_v18 = vld [vmem:[%s726_s2] sm:$0x3] }
  0x46   :  { %v47_v20 = vrot.slane %v42_v18, %v46_v17  ;;  %v51_v21 = vrot.slane %v42_v18, %v50_v19  ;;  %v200_v38 = vrot.slane %v195_v37, %v46_v17 }
  0x48   :  { %480 = vmatpush1.bf16.msra.mxu1 %v479_v23 }
  0x49   :  { %482 = vmatprep.subr.bf16.mxu1 %v481_v24 }
  0x4c   :  { %484 = vmatpush1.bf16.msra.mxu1 %v483_v29  ;;  %v293_v29 = vld [vmem:[%s729_s5 + $0x68] sm:$0xff] }
  0x4d   :  { %486 = vmatprep.subr.bf16.mxu1 %v485_v30  ;;  %v519_v30 = vpack.c.bf16 %v293_v29, %v292_v28 }
  0x4f   :  { %520 = vmatpush3.bf16.msra.mxu0 %v519_v30 }
  0x50   :  { %488 = vmatpush1.bf16.msra.mxu1 %v487_v33  ;;  %v521_v33 = vpack.c.bf16 %v311_v32, %v310_v31 }
  0x51   :  { %490 = vmatprep.subr.bf16.mxu1 %v489_v36  ;;  %v523_v36 = vpack.c.bf16 %v295_v35, %v294_v34 }
  0x52   :  { %522 = vmatprep.subr.bf16.mxu0 %v521_v33 }
  0x53   :  { %524 = vmatpush3.bf16.msra.mxu0 %v523_v36 }
  0x54   :  { %492 = vmatpush1.bf16.msra.mxu1 %v491_v39  ;;  %v204_v39 = vrot.slane %v195_v37, %v50_v19 }
  0xec   :  { %v124_v22 = vpop.f32.mrb[0].mxu0 }
  0xed   :  { %v125_v23 = vadd.f32 %v124_v22, %v47_v20  ;;  %v126_v24 = vpop.f32.mrb[1].mxu0 }
  0xee   :  { %v127_v25 = vadd.f32 %v126_v24, %v51_v21 }
  0xef   :  { %v129_v27 = vmax.f32 %v125_v23, 0.0 }
  0xf0   :  { %v130_v26 = vmax.f32 %v127_v25, 0.0 }
  0xf2   :  { %271 = vmatprep.mubr.f32.mxu1 %v130_v26 }
  0xf3   :  { %272 = vmatmul.mubr.f32.vlgmr.msra.gmra.mrb[0].mxu1 %v129_v27 }
 0x1c6   :  { %v273_v40 = vpop.f32.mrb[0].mxu1 }
 0x1c7   :  { %v274_v41 = vadd.f32 %v273_v40, %v200_v38  ;;  %v275_v42 = vpop.f32.mrb[1].mxu1 }
 0x1c8   :  { %v276_v43 = vadd.f32 %v275_v42, %v204_v39 }
 0x1c9   :  { %v278_v45 = vmax.f32 %v274_v41, 0.0 }
 0x1ca   :  { %v279_v44 = vmax.f32 %v276_v43, 0.0 }
 0x1cc   :  { %376 = vmatprep.mubr.f32.mxu0 %v279_v44 }
 0x1cd   :  { %377 = vmatmul.mubr.f32.vlgmr.msra.gmra.mrb[2].mxu0 %v278_v45 }
 0x2a0   :  { %v422_v46 = vpop.f32.mrb[2].mxu0 }
 0x2a1   :  { %v423_v47 = vpop.f32.mrb[3].mxu0 }
 0x2a2   :  { %v424_v48 = vadd.f32 %v423_v47, %v422_v46 }
 0x2a4   :  { %383 = vst.msk [vmem:[%s730_s6] sm:$0xff] %vm382_vm1, %v424_v48 }
 0x2a5   :  { %388 = vsyncpa [#allocation3], 1 }

</bundles_post_ra>
